<compile_context>
chip_gen: v6e
topology: v6e:2x2x1
jax: 0.10.0
libtpu: 0.0.40
codegen_flags: <defaults>
</compile_context>

<pallas_src>
import jax
import jax.numpy as jnp
from jax.experimental import pallas as pl
from jax.experimental.pallas import tpu as pltpu


def _pos_enc_kernel(x_ref, pe_ref, o_ref):
    # x_ref: (bm, bn) block; pe_ref: (1, bn) VMEM-resident table row.
    # jnp promotion handles bf16 x + f32 pe -> f32 (torch parity); cast at store.
    o_ref[...] = (x_ref[...] + pe_ref[...]).astype(o_ref.dtype)


def make_pe_buffer(n_hid, max_len=1000, dtype=jnp.float32):
    """Reproduces the PyTorch __init__ exactly (same precedence / f32 overflow)."""
    position = jnp.arange(0.0, max_len, dtype=dtype)[:, None]                 # (max_len, 1)
    # Matches torch precedence:  1 / ((10000 ** arange(0, n_hid, 2)) / n_hid)
    div_term = 1.0 / ((10000.0 ** jnp.arange(0.0, n_hid, 2.0, dtype=dtype)) / n_hid)
    angles = position * div_term                                              # (max_len, n_hid//2)
    pe = jnp.zeros((max_len, n_hid), dtype=dtype)
    pe = pe.at[:, 0::2].set(jnp.sin(angles))
    pe = pe.at[:, 1::2].set(jnp.cos(angles))
    pe = pe / jnp.sqrt(jnp.asarray(n_hid, dtype))
    return pe                                                                 # (max_len, n_hid)


def prepare_pe_slab(pe_full, L):
    """Hoisted per-L prep (do once at init, not per forward): (1, L*H) float32 slab."""
    L_, H = pe_full.shape[0], pe_full.shape[1]
    assert L <= L_
    return pe_full[:L, :].reshape(1, L * H)


def _pick_block(total, unit, cap):
    """Largest multiple of `unit` that divides `total` exactly and is <= cap (0 if impossible)."""
    if total <= 0 or total % unit != 0:
        return 0
    n = total // unit
    k = min(n, max(1, cap // unit))
    while k > 1 and n % k != 0:
        k -= 1
    return k * unit


def _choose_blocks(rows, lh, itemsize, target_bytes=2 << 20):
    """Pick (bm, bn): ~target-sized, lane-dense, exact-dividing blocks; >=2 (even) grid steps."""
    # Lane-axis block: full width unless a minimal 8-row slab already exceeds the target.
    if lh % 128 == 0 and 8 * lh * itemsize > target_bytes:
        bn = _pick_block(lh, 128, max(128, target_bytes // (8 * itemsize)))
        if bn == 0:
            bn = lh
    else:
        bn = lh

    # Row-axis block: multiple of 8 dividing rows, sized to ~target bytes per block.
    cap_rows = max(8, target_bytes // max(1, bn * itemsize))
    bm = _pick_block(rows, 8, cap_rows)
    if bm == 0:            # rows not a multiple of 8 -> whole axis is always legal
        bm = rows

    # v7x: guarantee >= 2 grid steps so both TensorCores get work.
    gm, gn = pl.cdiv(rows, bm), pl.cdiv(lh, bn)
    if gm * gn == 1:
        if rows % 16 == 0:
            bm = rows // 2          # still a multiple of 8, still divides rows
        elif lh % 256 == 0:
            bn = lh // 2            # still a multiple of 128, still divides lh
        # else: tiny / oddly shaped input -- a single step is fine.

    # Prefer an even total step count (v7x core pairing).
    total = pl.cdiv(rows, bm) * pl.cdiv(lh, bn)
    if total > 1 and total % 2 == 1:
        if bm % 16 == 0:
            bm //= 2
        elif bn % 256 == 0:
            bn //= 2
    return bm, bn


def positional_encoding(x, pe_slab):
    """x: (B, K, L, H); pe_slab: (1, L*H) float32 from prepare_pe_slab. Eval-mode dropout."""
    B, K, L, H = x.shape
    rows, lh = B * K, L * H
    assert pe_slab.shape == (1, lh)

    xf = x.reshape(rows, lh)                                   # lane-dense slab
    itemsize = jnp.dtype(x.dtype).itemsize
    bm, bn = _choose_blocks(rows, lh, itemsize)
    grid = (pl.cdiv(rows, bm), pl.cdiv(lh, bn))

    out_dtype = jnp.result_type(x.dtype, pe_slab.dtype)        # torch-style promotion
    out_itemsize = jnp.dtype(out_dtype).itemsize
    # In-place add: output reuses x's HBM buffer when dtypes match (blocks are disjoint).
    aliases = {0: 0} if out_dtype == x.dtype else {}

    cost = pl.CostEstimate(
        flops=rows * lh,
        transcendentals=0,
        bytes_accessed=rows * lh * (itemsize + out_itemsize)
        + lh * jnp.dtype(pe_slab.dtype).itemsize,
    )

    out = pl.pallas_call(
        _pos_enc_kernel,
        out_shape=jax.ShapeDtypeStruct((rows, lh), out_dtype),
        grid_spec=pltpu.PrefetchScalarGridSpec(
            num_scalar_prefetch=0,
            grid=grid,
            in_specs=[
                pl.BlockSpec((bm, bn), lambda i, j: (i, j)),   # lane-dense x block
                pl.BlockSpec((1, bn), lambda i, j: (0, j)),    # pe row, resident across i
            ],
            out_specs=pl.BlockSpec((bm, bn), lambda i, j: (i, j)),
        ),
        compiler_params=pltpu.CompilerParams(
            dimension_semantics=("parallel", "parallel")),
        input_output_aliases=aliases,
        cost_estimate=cost,
    )(xf, pe_slab)

    return out.reshape(B, K, L, H)


if __name__ == "__main__":
    B, K, L, H = 2, 4, 16, 32      # batch, n_contexts, seq_len, n_hid
    MAX_LEN = 1000

    key = jax.random.PRNGKey(0)
    x = jax.random.normal(key, (B, K, L, H), dtype=jnp.float32)

    pe_full = make_pe_buffer(H, max_len=MAX_LEN)               # (max_len, H), float32
    pe_slab = prepare_pe_slab(pe_full, L)                      # hoisted: (1, L*H)

    # Pure-JAX reference of the forward pass (eval-mode dropout == identity),
    # computed before the kernel so the aliased/in-place output cannot affect it.
    ref = x + pe_full[:L, :][None, None, :, :]

    out = positional_encoding(x, pe_slab)
    out = jax.block_until_ready(out)

    assert out.shape == x.shape and out.dtype == ref.dtype
    assert jnp.allclose(out, ref, atol=1e-6, rtol=1e-6), "mismatch vs reference"

    print("KERNEL_OK")
</pallas_src>

<mosaic_0001>
module attributes {stable_mosaic.version = 11 : i64} {
  func.func @_pos_enc_kernel(%arg0: i32, %arg1: i32, %arg2: memref<8x256xf32, #tpu.memory_space<vmem>>, %arg3: memref<1x256xf32, #tpu.memory_space<vmem>>, %arg4: memref<8x256xf32, #tpu.memory_space<vmem>>) attributes {dimension_semantics = [#tpu.dimension_semantics<parallel>, #tpu.dimension_semantics<parallel>], iteration_bounds = array<i64: 1, 2>, scalar_prefetch = 0 : i64, scratch_operands = 0 : i64, tpu.core_type = #tpu.core_type<tc>, window_params = [{transform_indices = @transform_0, window_bounds = array<i64: 8, 256>}, {transform_indices = @transform_1, window_bounds = array<i64: 1, 256>}, {transform_indices = @transform_2, window_bounds = array<i64: 8, 256>}]} {
    %c0 = arith.constant 0 : index
    %c0_0 = arith.constant 0 : index
    %0 = vector.load %arg2[%c0, %c0_0] : memref<8x256xf32, #tpu.memory_space<vmem>>, vector<8x256xf32>
    %c0_1 = arith.constant 0 : index
    %c0_2 = arith.constant 0 : index
    %1 = vector.load %arg3[%c0_1, %c0_2] : memref<1x256xf32, #tpu.memory_space<vmem>>, vector<1x256xf32>
    %2 = vector.broadcast %1 : vector<1x256xf32> to vector<8x256xf32>
    %3 = arith.addf %0, %2 : vector<8x256xf32>
    %c0_3 = arith.constant 0 : index
    %c0_4 = arith.constant 0 : index
    %4 = vector.load %arg4[%c0_3, %c0_4] : memref<8x256xf32, #tpu.memory_space<vmem>>, vector<8x256xf32>
    tpu.vector_store %arg4[%c0_3, %c0_4], %3 {strides = array<i32>} : memref<8x256xf32, #tpu.memory_space<vmem>>, vector<8x256xf32>,
    return
  }
  func.func @transform_0(%arg0: i32, %arg1: i32) -> (i32, i32) {
    %c0_i32 = arith.constant 0 : i32
    return %arg0, %arg1 : i32, i32
  }
  func.func @transform_1(%arg0: i32, %arg1: i32) -> (i32, i32) {
    %c0_i32 = arith.constant 0 : i32
    %c0_i32_0 = arith.constant 0 : i32
    return %c0_i32, %arg1 : i32, i32
  }
  func.func @transform_2(%arg0: i32, %arg1: i32) -> (i32, i32) {
    %c0_i32 = arith.constant 0 : i32
    return %arg0, %arg1 : i32, i32
  }
}

</mosaic_0001>

<bundles_post_ra>
// kernel: tpu_custom_call.1
= control target key start
LH: loop header
LB: loop body
LE: loop exit
PB: predicated region body
PF: predicated region fallthrough
CT: control target
= control target key end

     0   :  { %7 = vsyncpa [#allocation3], 0  ;;  %s678_s0 = inlined_call_operand.hbm [shape: f32[8,512], index: 0, kind: input, shape index: {}, may-alias: {0,2}]   ;;  %s679_s1 = inlined_call_operand.vmem [shape: f32[1,512], index: 1, kind: input, shape index: {}]   ;;  %s680_s2 = inlined_call_operand.hbm [shape: f32[8,512], index: 2, kind: output, shape index: {}, may-alias: {0,2}]  }
   0x1   :  { %9 = vsyncpa [#allocation3 + $0x1], 0 }
   0x2   :  { %10 = vsyncpa [#allocation4], 0 }
   0x3   :  { %12 = vsyncpa [#allocation4 + $0x1], 0  ;;  %s534_s9 = smov 0   ;;  %s536_s10 = smov 0  }
   0x4   :  { %s538_s11 = smov 0   ;;  %s540_s12 = smov 0  }
   0x5   :  { %s542_s13 = smov 0   ;;  %s544_s14 = smov 0  }
   0x6 LB: > { %s327_s15 = sadd.s32 4294967295, %s515_s14   ;;  %s328_s16 = sadd.s32 4294967294, %s515_s14   ;;  %s515_s14 = sphi %s544_s14, %s18_s14   ;;  %s511_s13 = sphi %s542_s13, %s692_s13   ;;  %s507_s12 = sphi %s540_s12, %s691_s12   ;;  %s503_s11 = sphi %s538_s11, %s690_s11   ;;  %s499_s10 = sphi %s536_s10, %s689_s10   ;;  %s495_s9 = sphi %s534_s9, %s688_s9  }
   0x7   : > { %s27_s17 = sadd.s32 1, %s511_s13  ;;  %s39_s18 = sadd.s32 1, %s503_s11 }
   0x8   : > { %p28_p0 = scmp.ge.s32.totalorder %s27_s17, 2  ;;  %p46_p1 = scmp.ne.s32.totalorder %s503_s11, %s499_s10 }
   0x9   : > { %p47_p2 = scmp.eq.s32.totalorder %s515_s14, 0  ;;  %p52_p3 = scmp.ne.s32.totalorder %s499_s10, %s495_s9 }
   0xa   : > { %s694_s17 = smov (%p28_p0, %s27_s17), 0  ;;  %p53_p5 = scmp.eq.s32.totalorder %s327_s15, 0 }
   0xb   : > { %p575_p4 = por %p47_p2, %p46_p1  ;;  %s35_s20 = ssub.s32 %s511_s13, %s694_s17 }
   0xc   : > { %p104_p6 = scmp.eq.s32.totalorder %s327_s15, 1  ;;  %p37_p7 = scmp.eq.s32.totalorder %s35_s20, 0 }
   0xd   : > { %p581_p8 = por %p53_p5, %p52_p3  ;;  %p110_p10 = scmp.eq.s32.totalorder %s328_s16, 1 }
   0xe   : > { %p585_p9 = por %p104_p6, %p46_p1  ;;  %p357_p13 = scmp.lt.s32.totalorder %s515_s14, 2 }
   0xf   : > { %s590_s23 = scalar_select %p37_p7, %s503_s11, %s39_s18  }
  0x10   : > { %p592_p11 = por %p110_p10, %p52_p3  ;;  %s130_s25 = sand.u32 1, %s503_s11  }
  0x11   : > { %s331_s26 = sshll.u32 %s130_s25, 4  ;;  %s343_s27 = sshll.u32 %s511_s13, 8 }
  0x12   : > { %s684_s24 = scalar_select %p592_p11, 1, 0 }
  0x13   : > { %s142_s30 = scalar_lea.hbm %s678_s0, %s343_s27  ;;  %s134_s3 = scalar_lea.vmem [#allocation2], %s331_s26 }
  0x14   : > { %s144_s4 = sshll.u32 %s134_s3, 4  ;;  %p605_p0 = pnand %p357_p13, %p575_p4  ;;  %s145_s4 = int_to_ptr.vmem [resolvable:$true] %s144_s4 }
  0x15   : > { %p334_p1 = scmp.ge.s32.totalorder %s515_s14, 1  ;;  %p157_p2 = scmp.lt.s32.totalorder %s515_s14, 3 }
  0x16   : > { %s131_s6 = scalar_lea.sflag [#allocation3], %s130_s25  ;;  %p409_p3 = pneg %p605_p0 }
  0x17   : > { %s420_s7 = scalar_lea.vmem %s145_s4, 256  ;;  %s517_s8 = smov [#allocation2]  }
  0x18   : > { %p421_p5 = scmp.ne.s32.totalorder %s145_s4, %s420_s7  ;;  %s425_s15 = sshll.u32 %s517_s8, 4  ;;  %s426_s15 = int_to_ptr.vmem [resolvable:$false] %s425_s15 }
  0x19   : > { %s427_s16 = scalar_lea.vmem %s426_s15, 512  ;;  %p428_p10 = scmp.lt.s32.totalorder %s145_s4, %s426_s15 }
  0x1a   : > { %p423_p6 = pnand %p421_p5, %p409_p3  ;;  %p429_p12 = scmp.lt.s32.totalorder %s427_s16, %s420_s7 }
  0x1c   : > { %p424_p7 = pneg %p423_p6  ;;  %p430_p4 = por %p429_p12, %p428_p10 }
  0x1e   : > { %p431_p13 = pnand %p430_p4, %p424_p7 }
  0x20   : > { %434 = shalt.err (!%p431_p13)
}
  0x21   : > { %352 = dma.hbm_to_vmem [thread:$0]  (!%p605_p0), %s142_s30, 256, %s145_s4, %s131_s6  }
  0x22   : > { %p158_p11 = pnand %p334_p1, %p157_p2 }
  0x23   : > { %s620_s18 = sand.u32 (!%p158_p11), 1, %s499_s10  }
  0x24   : > { %161 = sbr.rel (%p158_p11) target bundleno = 68 (0x44), region = 28  ;;  %s335_s19 = sshll.u32 (!%p158_p11), %s620_s18, 4 }
  0x25   : > { %s164_s20 = scalar_lea.sflag (!%p158_p11), [#allocation3], %s620_s18  ;;  %s167_s25 = scalar_lea.vmem (!%p158_p11), [#allocation2], %s335_s19 }
  0x29   : > { %486 = dma.done.wait (%p581_p8), %s164_s20, 256  }
  0x2a   : > { %488 = vsyncadd (%p581_p8), %s164_s20, 4294967040  ;;  %s337_s26 = sshll.u32 %s507_s12, 1  ;;  %v203_v0 = vlaneseq  ;;  %s191_s30 = scalar_lea.vmem [#allocation5], %s335_s19  ;;  %v199_v4 = vld [vmem:[%s167_s25] sm:$0xff]  ;;  %v200_v6 = vld [vmem:[%s167_s25 + $0x8] sm:$0xff] }
  0x2b   : > { %p194_p12 = scmp.lt.s32.totalorder %s337_s26, 3  ;;  %s234_s3 = sshll.u32 %s191_s30, 4  ;;  %s633_s3 = int_to_ptr.vmem [resolvable:$true] %s234_s3 }
  0x2c   : > { %v204_v1 = vshrl.u32 %v203_v0, 7  ;;  %s344_s21 = sshll.u32 %s507_s12, 8  ;;  %s218_s7 = scalar_lea.sflag [#allocation4], %s620_s18 }
  0x2d   : > { %s696_s26 = smov (!%p194_p12, %s337_s26), 3  ;;  %s232_s6 = scalar_lea.hbm %s680_s2, %s344_s21 }
  0x2e   : > { %v205_v2 = vsub.s32 0, %v204_v1  ;;  %v209_v3 = vsub.s32 1, %v204_v1  ;;  %s196_s29 = scalar_lea.vmem %s679_s1, %s696_s26  ;;  %s435_s8 = scalar_lea.vmem %s633_s3, 256 }
  0x2f   : > { %v201_v5 = vld [vmem:[%s196_s29] sm:$0x3]  ;;  %p436_p8 = scmp.ne.s32.totalorder %s633_s3, %s435_s8  ;;  %s518_s12 = smov [#allocation5]  }
  0x30   : > { %v206_v7 = vrot.slane %v201_v5, %v205_v2  ;;  %v210_v8 = vrot.slane %v201_v5, %v209_v3  ;;  %s439_s15 = sshll.u32 %s518_s12, 4  ;;  %s440_s15 = int_to_ptr.vmem [resolvable:$false] %s439_s15 }
  0x31   : > { %p437_p11 = pnand %p436_p8, %p585_p9  ;;  %s441_s16 = scalar_lea.vmem %s440_s15, 512 }
  0x32   : > { %v213_v9 = vadd.f32 %v206_v7, %v199_v4  ;;  %v214_v10 = vadd.f32 %v210_v8, %v200_v6  ;;  %p442_p1 = scmp.lt.s32.totalorder %s633_s3, %s440_s15  ;;  %p443_p2 = scmp.lt.s32.totalorder %s441_s16, %s435_s8 }
  0x33   : > { %p438_p0 = pneg %p437_p11 }
  0x34   : > { %215 = vst [vmem:[%s191_s30] sm:$0xff] %v213_v9  ;;  %216 = vst [vmem:[%s191_s30 + $0x8] sm:$0xff] %v214_v10  ;;  %p444_p3 = por %p443_p2, %p442_p1 }
  0x36   : > { %p445_p5 = pnand %p444_p3, %p438_p0 }
  0x38   : > { %448 = shalt.err (!%p445_p5)
}
  0x39   : > { %s449_s19 = scalar_lea.hbm %s232_s6, 256  ;;  %s453_s25 = scalar_lea.hbm %s680_s2, 512 }
  0x3a   : > { %p450_p6 = scmp.ne.s32.totalorder %s232_s6, %s449_s19  ;;  %p454_p4 = scmp.lt.s32.totalorder %s232_s6, %s680_s2 }
  0x3b   : > { %p455_p13 = scmp.lt.s32.totalorder %s453_s25, %s449_s19 }
  0x3c   : > { %p451_p7 = pnand %p450_p6, %p585_p9 }
  0x3d   : > { %p456_p12 = por %p455_p13, %p454_p4 }
  0x3e   : > { %p452_p10 = pneg %p451_p7 }
  0x40   : > { %p457_p8 = pnand %p456_p12, %p452_p10 }
  0x42   : > { %460 = shalt.err (!%p457_p8)
}
  0x43   : > { %347 = dma.vmem_to_hbm [thread:$0]  (%p585_p9), %s633_s3, 256, %s232_s6, %s218_s7  }
  0x44 PF: > { %s246_s28 = sand.u32 1, %s495_s9   ;;  %p686_p11 = scmp.ne.s32.totalorder %s684_s24, 0 }
  0x45   : > { %p687_p0 = scmp.ge.s32.totalorder %s515_s14, 2  ;;  %s247_s29 = scalar_lea.sflag [#allocation4], %s246_s28 }
  0x47   : > { %p354_p1 = pnand %p687_p0, %p686_p11 }
  0x49   : > { %p355_p2 = pneg %p354_p1 }
  0x4b   : > { %490 = dma.done.wait (%p355_p2), %s247_s29, 256  }
  0x4c   : > { %492 = vsyncadd (%p355_p2), %s247_s29, 4294967040  ;;  %s18_s14 = sadd.s32 1, %s515_s14   ;;  %s688_s9 = smov %s499_s10 }
  0x4d   : > { %p15_p3 = scmp.ge.s32.totalorder %s18_s14, 4   ;;  %s689_s10 = smov %s503_s11 }
  0x4e   : > { %s690_s11 = smov %s590_s23  ;;  %s691_s12 = smov %s511_s13 }
  0x4f   : > { %s692_s13 = smov %s694_s17  ;;  %17 = sbr.rel (!%p15_p3) target bundleno = 6 (0x6), region = 76 }
  0x54   :  { %252 = vsyncpa [#allocation3], 1 }
  0x55   :  { %254 = vsyncpa [#allocation3 + $0x1], 1 }
  0x56   :  { %255 = vsyncpa [#allocation4], 1 }
  0x57   :  { %257 = vsyncpa [#allocation4 + $0x1], 1 }

</bundles_post_ra>
